<compile_context>
chip_gen: v5e
topology: v5e:2x2
jax: 0.10.0
libtpu: 0.0.40
codegen_flags: <defaults>
</compile_context>

<pallas_src>
import functools

import jax
import jax.numpy as jnp
from jax.experimental import pallas as pl
from jax.experimental.pallas import tpu as pltpu


def _round_up(x, m):
    return (x + m - 1) // m * m


# ----------------------------- Pallas kernel ------------------------------

def _basic_block_kernel(x_ref, masks_ref, w1_ref, b1_ref, w2_ref, b2_ref,
                        o_ref, *, w):
    # x_ref    : (C_pad, HW_pad) bf16   one batch element, channels on sublanes
    # masks_ref: (9, 1, HW_pad)  f32    per-tap validity masks (zero padding=1)
    # w*_ref   : (C_pad, 9*C_pad) bf16  BN-scale-folded conv weights
    # b*_ref   : (C_pad, 1) f32         folded BN bias
    # o_ref    : (C_pad, HW_pad) f32
    hwp = x_ref.shape[-1]

    # Load the 9 tap masks once; reused by both convolutions.
    masks = [masks_ref[k] for k in range(9)]            # each (1, HW_pad) f32

    def im2col(img):
        """img: (C_pad, HW_pad) f32 -> (9*C_pad, HW_pad) bf16 im2col slab.

        Tap k = kh*3 + kw reads input offset (kh-1, kw-1).  Shifts are static
        lane rolls on the flat spatial axis; the masks zero out row-wrap /
        image-boundary artifacts (equivalent to zero padding=1)."""
        taps = []
        for k in range(9):
            kh, kw = divmod(k, 3)
            s = (kh - 1) * w + (kw - 1)
            # shifted[p] = img[(p + s) mod hwp]  (jnp.roll with shift = -s)
            shifted = pltpu.roll(img, (-s) % hwp, axis=1) if s != 0 else img
            taps.append(shifted * masks[k])
        # Concatenate in f32: 8-row pieces stay aligned to the (8,128) tile.
        return jnp.concatenate(taps, axis=0).astype(jnp.bfloat16)

    x = x_ref[...].astype(jnp.float32)

    # conv1 (+bn1 scale) -> bias -> relu   — kept entirely in VMEM / vregs.
    y1 = jnp.dot(w1_ref[...], im2col(x), preferred_element_type=jnp.float32)
    out1 = jnp.maximum(y1 + b1_ref[...], 0.0)

    # conv2 (+bn2 scale) -> bias -> residual add -> relu.
    y2 = jnp.dot(w2_ref[...], im2col(out1), preferred_element_type=jnp.float32)
    o_ref[...] = jnp.maximum(y2 + b2_ref[...] + x, 0.0)


# ------------------------------ host wrappers ------------------------------

def _prep_conv_bn(w, gamma, beta, mean, var, c_pad, eps=1e-5):
    """Fold inference BN into the conv, pad channels, reshape for the
    single-matmul layout.  Returns ((c_pad, 9*c_pad) bf16, (c_pad, 1) f32)."""
    c_out, c_in = w.shape[0], w.shape[1]
    scale = gamma / jnp.sqrt(var + eps)                    # (c_out,)
    bias = beta - mean * scale                             # (c_out,)
    w = w * scale[:, None, None, None]                     # fold scale into conv
    w = jnp.pad(w, ((0, c_pad - c_out), (0, c_pad - c_in), (0, 0), (0, 0)))
    bias = jnp.pad(bias, (0, c_pad - c_out))
    # (c_pad, c_pad, 3, 3) -> (c_pad, kh, kw, c_in) -> (c_pad, 9*c_pad)
    # column order k*c_pad + c_in with k = kh*3 + kw, matching the slab rows.
    w_mat = jnp.transpose(w, (0, 2, 3, 1)).reshape(c_pad, 9 * c_pad)
    return w_mat.astype(jnp.bfloat16), bias[:, None].astype(jnp.float32)


def _build_tap_masks(h, w, hw_pad):
    """(9, 1, hw_pad) f32 validity masks for the 9 taps of a 3x3, pad=1 conv.

    Built on the host (once) so the kernel needs no iota / integer div-mod."""
    pos = jnp.arange(hw_pad, dtype=jnp.int32)
    row, col = pos // w, pos % w
    masks = []
    for kh in range(3):
        for kw in range(3):
            oh, ow = kh - 1, kw - 1
            masks.append((row + oh >= 0) & (row + oh < h) &
                         (col + ow >= 0) & (col + ow < w))
    return jnp.stack(masks).astype(jnp.float32).reshape(9, 1, hw_pad)


def basic_block_forward(x, params):
    """x: (N, C, H, W) f32, inplanes == planes, stride=1, no downsample."""
    n, c, h, w = x.shape
    hw = h * w
    c_pad = _round_up(c, 8)        # full f32 sublane tiles for epilogue/output
    hw_pad = _round_up(hw, 128)    # lane-dense, unmasked stores

    w1, b1 = _prep_conv_bn(params["conv1_w"], params["bn1_gamma"],
                           params["bn1_beta"], params["bn1_mean"],
                           params["bn1_var"], c_pad)
    w2, b2 = _prep_conv_bn(params["conv2_w"], params["bn2_gamma"],
                           params["bn2_beta"], params["bn2_mean"],
                           params["bn2_var"], c_pad)
    masks = _build_tap_masks(h, w, hw_pad)

    x_flat = jnp.pad(x.reshape(n, c, hw),
                     ((0, 0), (0, c_pad - c), (0, hw_pad - hw)))
    x_flat = x_flat.astype(jnp.bfloat16)

    kernel = functools.partial(_basic_block_kernel, w=w)

    out = pl.pallas_call(
        kernel,
        out_shape=jax.ShapeDtypeStruct((n, c_pad, hw_pad), jnp.float32),
        grid_spec=pltpu.PrefetchScalarGridSpec(
            num_scalar_prefetch=0,
            grid=(n,),
            in_specs=[
                pl.BlockSpec((None, c_pad, hw_pad), lambda i: (i, 0, 0)),   # x
                pl.BlockSpec((9, 1, hw_pad), lambda i: (0, 0, 0)),          # masks
                pl.BlockSpec((c_pad, 9 * c_pad), lambda i: (0, 0)),         # w1
                pl.BlockSpec((c_pad, 1), lambda i: (0, 0)),                 # b1
                pl.BlockSpec((c_pad, 9 * c_pad), lambda i: (0, 0)),         # w2
                pl.BlockSpec((c_pad, 1), lambda i: (0, 0)),                 # b2
            ],
            out_specs=pl.BlockSpec((None, c_pad, hw_pad), lambda i: (i, 0, 0)),
        ),
        compiler_params=pltpu.CompilerParams(
            dimension_semantics=("parallel",)),
    )(x_flat, masks, w1, b1, w2, b2)

    return out[:, :c, :hw].reshape(n, c, h, w)


# ------------------------------ pure-JAX ref ------------------------------

def _ref_forward(x, params):
    def conv(x_, w_):
        return jax.lax.conv_general_dilated(
            x_, w_, (1, 1), ((1, 1), (1, 1)),
            dimension_numbers=("NCHW", "OIHW", "NCHW"))

    def bn(x_, g, b, m, v, eps=1e-5):
        g = g[None, :, None, None]
        b = b[None, :, None, None]
        m = m[None, :, None, None]
        v = v[None, :, None, None]
        return g * (x_ - m) / jnp.sqrt(v + eps) + b

    out = jax.nn.relu(bn(conv(x, params["conv1_w"]),
                         params["bn1_gamma"], params["bn1_beta"],
                         params["bn1_mean"], params["bn1_var"]))
    out = bn(conv(out, params["conv2_w"]),
             params["bn2_gamma"], params["bn2_beta"],
             params["bn2_mean"], params["bn2_var"])
    return jax.nn.relu(out + x)


# ---------------------------------- main ----------------------------------

if __name__ == "__main__":
    N, C, H, W = 2, 4, 16, 16          # inplanes == planes == 4, stride=1
    key = jax.random.PRNGKey(0)
    k_x, k_w1, k_w2 = jax.random.split(key, 3)

    x = jax.random.normal(k_x, (N, C, H, W), dtype=jnp.float32)

    params = {
        "conv1_w": 0.1 * jax.random.normal(k_w1, (C, C, 3, 3), dtype=jnp.float32),
        "conv2_w": 0.1 * jax.random.normal(k_w2, (C, C, 3, 3), dtype=jnp.float32),
        # deterministic (non-trivial) BatchNorm parameters / running stats
        "bn1_gamma": 1.0 + 0.1 * jnp.arange(C, dtype=jnp.float32),
        "bn1_beta": 0.05 * jnp.arange(C, dtype=jnp.float32),
        "bn1_mean": 0.02 * jnp.arange(C, dtype=jnp.float32),
        "bn1_var": 1.0 + 0.1 * jnp.arange(C, dtype=jnp.float32),
        "bn2_gamma": 1.0 - 0.05 * jnp.arange(C, dtype=jnp.float32),
        "bn2_beta": -0.03 * jnp.arange(C, dtype=jnp.float32),
        "bn2_mean": -0.01 * jnp.arange(C, dtype=jnp.float32),
        "bn2_var": 1.0 + 0.05 * jnp.arange(C, dtype=jnp.float32),
    }

    out = basic_block_forward(x, params)
    out = jax.block_until_ready(out)

    ref = _ref_forward(x, params)
    assert out.shape == (N, C, H, W)
    # bf16 inputs/weights with f32 accumulate -> loosened tolerance vs f32 ref.
    assert jnp.allclose(out, ref, rtol=5e-2, atol=5e-2), "mismatch vs reference"

    print("KERNEL_OK")
</pallas_src>

<mosaic_0001>
module attributes {stable_mosaic.version = 11 : i64} {
  func.func @_basic_block_kernel(%arg0: i32, %arg1: memref<1x8x256xbf16, #tpu.memory_space<vmem>>, %arg2: memref<9x1x256xf32, #tpu.memory_space<vmem>>, %arg3: memref<8x72xbf16, #tpu.memory_space<vmem>>, %arg4: memref<8x1xf32, #tpu.memory_space<vmem>>, %arg5: memref<8x72xbf16, #tpu.memory_space<vmem>>, %arg6: memref<8x1xf32, #tpu.memory_space<vmem>>, %arg7: memref<1x8x256xf32, #tpu.memory_space<vmem>>) attributes {dimension_semantics = [#tpu.dimension_semantics<parallel>], iteration_bounds = array<i64: 2>, scalar_prefetch = 0 : i64, scratch_operands = 0 : i64, tpu.core_type = #tpu.core_type<tc>, window_params = [{transform_indices = @transform_0, window_bounds = array<i64: 1, 8, 256>}, {pipeline_mode = #tpu.pipeline_mode<synchronous>, transform_indices = @transform_1, window_bounds = array<i64: 9, 1, 256>}, {pipeline_mode = #tpu.pipeline_mode<synchronous>, transform_indices = @transform_2, window_bounds = array<i64: 8, 72>}, {pipeline_mode = #tpu.pipeline_mode<synchronous>, transform_indices = @transform_3, window_bounds = array<i64: 8, 1>}, {pipeline_mode = #tpu.pipeline_mode<synchronous>, transform_indices = @transform_4, window_bounds = array<i64: 8, 72>}, {pipeline_mode = #tpu.pipeline_mode<synchronous>, transform_indices = @transform_5, window_bounds = array<i64: 8, 1>}, {transform_indices = @transform_6, window_bounds = array<i64: 1, 8, 256>}]} {
    %c0 = arith.constant 0 : index
    %c0_0 = arith.constant 0 : index
    %c0_1 = arith.constant 0 : index
    %0 = vector.load %arg2[%c0, %c0_0, %c0_1] : memref<9x1x256xf32, #tpu.memory_space<vmem>>, vector<1x1x256xf32>
    %1 = vector.shape_cast %0 : vector<1x1x256xf32> to vector<1x256xf32>
    %c1 = arith.constant 1 : index
    %c0_2 = arith.constant 0 : index
    %c0_3 = arith.constant 0 : index
    %2 = vector.load %arg2[%c1, %c0_2, %c0_3] : memref<9x1x256xf32, #tpu.memory_space<vmem>>, vector<1x1x256xf32>
    %3 = vector.shape_cast %2 : vector<1x1x256xf32> to vector<1x256xf32>
    %c2 = arith.constant 2 : index
    %c0_4 = arith.constant 0 : index
    %c0_5 = arith.constant 0 : index
    %4 = vector.load %arg2[%c2, %c0_4, %c0_5] : memref<9x1x256xf32, #tpu.memory_space<vmem>>, vector<1x1x256xf32>
    %5 = vector.shape_cast %4 : vector<1x1x256xf32> to vector<1x256xf32>
    %c3 = arith.constant 3 : index
    %c0_6 = arith.constant 0 : index
    %c0_7 = arith.constant 0 : index
    %6 = vector.load %arg2[%c3, %c0_6, %c0_7] : memref<9x1x256xf32, #tpu.memory_space<vmem>>, vector<1x1x256xf32>
    %7 = vector.shape_cast %6 : vector<1x1x256xf32> to vector<1x256xf32>
    %c4 = arith.constant 4 : index
    %c0_8 = arith.constant 0 : index
    %c0_9 = arith.constant 0 : index
    %8 = vector.load %arg2[%c4, %c0_8, %c0_9] : memref<9x1x256xf32, #tpu.memory_space<vmem>>, vector<1x1x256xf32>
    %9 = vector.shape_cast %8 : vector<1x1x256xf32> to vector<1x256xf32>
    %c5 = arith.constant 5 : index
    %c0_10 = arith.constant 0 : index
    %c0_11 = arith.constant 0 : index
    %10 = vector.load %arg2[%c5, %c0_10, %c0_11] : memref<9x1x256xf32, #tpu.memory_space<vmem>>, vector<1x1x256xf32>
    %11 = vector.shape_cast %10 : vector<1x1x256xf32> to vector<1x256xf32>
    %c6 = arith.constant 6 : index
    %c0_12 = arith.constant 0 : index
    %c0_13 = arith.constant 0 : index
    %12 = vector.load %arg2[%c6, %c0_12, %c0_13] : memref<9x1x256xf32, #tpu.memory_space<vmem>>, vector<1x1x256xf32>
    %13 = vector.shape_cast %12 : vector<1x1x256xf32> to vector<1x256xf32>
    %c7 = arith.constant 7 : index
    %c0_14 = arith.constant 0 : index
    %c0_15 = arith.constant 0 : index
    %14 = vector.load %arg2[%c7, %c0_14, %c0_15] : memref<9x1x256xf32, #tpu.memory_space<vmem>>, vector<1x1x256xf32>
    %15 = vector.shape_cast %14 : vector<1x1x256xf32> to vector<1x256xf32>
    %c8 = arith.constant 8 : index
    %c0_16 = arith.constant 0 : index
    %c0_17 = arith.constant 0 : index
    %16 = vector.load %arg2[%c8, %c0_16, %c0_17] : memref<9x1x256xf32, #tpu.memory_space<vmem>>, vector<1x1x256xf32>
    %17 = vector.shape_cast %16 : vector<1x1x256xf32> to vector<1x256xf32>
    %c0_18 = arith.constant 0 : index
    %c0_19 = arith.constant 0 : index
    %c0_20 = arith.constant 0 : index
    %18 = vector.load %arg1[%c0_18, %c0_19, %c0_20] : memref<1x8x256xbf16, #tpu.memory_space<vmem>>, vector<1x8x256xbf16>
    %19 = vector.shape_cast %18 : vector<1x8x256xbf16> to vector<8x256xbf16>
    %20 = arith.extf %19 : vector<8x256xbf16> to vector<8x256xf32>
    %c0_21 = arith.constant 0 : index
    %c0_22 = arith.constant 0 : index
    %21 = vector.load %arg3[%c0_21, %c0_22] : memref<8x72xbf16, #tpu.memory_space<vmem>>, vector<8x72xbf16>
    %c17_i32 = arith.constant 17 : i32
    %22 = tpu.dynamic_rotate %20 by %c17_i32 dim 1 : vector<8x256xf32>, i32 -> vector<8x256xf32>
    %23 = vector.broadcast %1 : vector<1x256xf32> to vector<8x256xf32>
    %24 = arith.mulf %22, %23 : vector<8x256xf32>
    %c16_i32 = arith.constant 16 : i32
    %25 = tpu.dynamic_rotate %20 by %c16_i32 dim 1 : vector<8x256xf32>, i32 -> vector<8x256xf32>
    %26 = vector.broadcast %3 : vector<1x256xf32> to vector<8x256xf32>
    %27 = arith.mulf %25, %26 : vector<8x256xf32>
    %c15_i32 = arith.constant 15 : i32
    %28 = tpu.dynamic_rotate %20 by %c15_i32 dim 1 : vector<8x256xf32>, i32 -> vector<8x256xf32>
    %29 = vector.broadcast %5 : vector<1x256xf32> to vector<8x256xf32>
    %30 = arith.mulf %28, %29 : vector<8x256xf32>
    %c1_i32 = arith.constant 1 : i32
    %31 = tpu.dynamic_rotate %20 by %c1_i32 dim 1 : vector<8x256xf32>, i32 -> vector<8x256xf32>
    %32 = vector.broadcast %7 : vector<1x256xf32> to vector<8x256xf32>
    %33 = arith.mulf %31, %32 : vector<8x256xf32>
    %34 = vector.broadcast %9 : vector<1x256xf32> to vector<8x256xf32>
    %35 = arith.mulf %20, %34 : vector<8x256xf32>
    %c255_i32 = arith.constant 255 : i32
    %36 = tpu.dynamic_rotate %20 by %c255_i32 dim 1 : vector<8x256xf32>, i32 -> vector<8x256xf32>
    %37 = vector.broadcast %11 : vector<1x256xf32> to vector<8x256xf32>
    %38 = arith.mulf %36, %37 : vector<8x256xf32>
    %c241_i32 = arith.constant 241 : i32
    %39 = tpu.dynamic_rotate %20 by %c241_i32 dim 1 : vector<8x256xf32>, i32 -> vector<8x256xf32>
    %40 = vector.broadcast %13 : vector<1x256xf32> to vector<8x256xf32>
    %41 = arith.mulf %39, %40 : vector<8x256xf32>
    %c240_i32 = arith.constant 240 : i32
    %42 = tpu.dynamic_rotate %20 by %c240_i32 dim 1 : vector<8x256xf32>, i32 -> vector<8x256xf32>
    %43 = vector.broadcast %15 : vector<1x256xf32> to vector<8x256xf32>
    %44 = arith.mulf %42, %43 : vector<8x256xf32>
    %c239_i32 = arith.constant 239 : i32
    %45 = tpu.dynamic_rotate %20 by %c239_i32 dim 1 : vector<8x256xf32>, i32 -> vector<8x256xf32>
    %46 = vector.broadcast %17 : vector<1x256xf32> to vector<8x256xf32>
    %47 = arith.mulf %45, %46 : vector<8x256xf32>
    %48 = tpu.concatenate %24, %27, %30, %33, %35, %38, %41, %44, %47 in 0 : vector<8x256xf32>, vector<8x256xf32>, vector<8x256xf32>, vector<8x256xf32>, vector<8x256xf32>, vector<8x256xf32>, vector<8x256xf32>, vector<8x256xf32>, vector<8x256xf32> -> vector<72x256xf32>
    %49 = arith.truncf %48 : vector<72x256xf32> to vector<72x256xbf16>
    %cst = arith.constant dense<0.000000e+00> : vector<8x256xf32>
    %50 = tpu.matmul %21, %49, %cst {dimension_numbers = #tpu.dot_dimension_numbers<[1], [0], [0], [1], [0, 0, 1, 1], [], []>} : vector<8x72xbf16>, vector<72x256xbf16>, vector<8x256xf32> -> vector<8x256xf32>
    %c0_23 = arith.constant 0 : index
    %c0_24 = arith.constant 0 : index
    %51 = vector.load %arg4[%c0_23, %c0_24] : memref<8x1xf32, #tpu.memory_space<vmem>>, vector<8x1xf32>
    %52 = vector.broadcast %51 : vector<8x1xf32> to vector<8x256xf32>
    %53 = arith.addf %50, %52 : vector<8x256xf32>
    %cst_25 = arith.constant 0.000000e+00 : f32
    %54 = vector.broadcast %cst_25 : f32 to vector<8x256xf32>
    %55 = arith.maximumf %53, %54 : vector<8x256xf32>
    %c0_26 = arith.constant 0 : index
    %c0_27 = arith.constant 0 : index
    %56 = vector.load %arg5[%c0_26, %c0_27] : memref<8x72xbf16, #tpu.memory_space<vmem>>, vector<8x72xbf16>
    %c17_i32_28 = arith.constant 17 : i32
    %57 = tpu.dynamic_rotate %55 by %c17_i32_28 dim 1 : vector<8x256xf32>, i32 -> vector<8x256xf32>
    %58 = vector.broadcast %1 : vector<1x256xf32> to vector<8x256xf32>
    %59 = arith.mulf %57, %58 : vector<8x256xf32>
    %c16_i32_29 = arith.constant 16 : i32
    %60 = tpu.dynamic_rotate %55 by %c16_i32_29 dim 1 : vector<8x256xf32>, i32 -> vector<8x256xf32>
    %61 = vector.broadcast %3 : vector<1x256xf32> to vector<8x256xf32>
    %62 = arith.mulf %60, %61 : vector<8x256xf32>
    %c15_i32_30 = arith.constant 15 : i32
    %63 = tpu.dynamic_rotate %55 by %c15_i32_30 dim 1 : vector<8x256xf32>, i32 -> vector<8x256xf32>
    %64 = vector.broadcast %5 : vector<1x256xf32> to vector<8x256xf32>
    %65 = arith.mulf %63, %64 : vector<8x256xf32>
    %c1_i32_31 = arith.constant 1 : i32
    %66 = tpu.dynamic_rotate %55 by %c1_i32_31 dim 1 : vector<8x256xf32>, i32 -> vector<8x256xf32>
    %67 = vector.broadcast %7 : vector<1x256xf32> to vector<8x256xf32>
    %68 = arith.mulf %66, %67 : vector<8x256xf32>
    %69 = vector.broadcast %9 : vector<1x256xf32> to vector<8x256xf32>
    %70 = arith.mulf %55, %69 : vector<8x256xf32>
    %c255_i32_32 = arith.constant 255 : i32
    %71 = tpu.dynamic_rotate %55 by %c255_i32_32 dim 1 : vector<8x256xf32>, i32 -> vector<8x256xf32>
    %72 = vector.broadcast %11 : vector<1x256xf32> to vector<8x256xf32>
    %73 = arith.mulf %71, %72 : vector<8x256xf32>
    %c241_i32_33 = arith.constant 241 : i32
    %74 = tpu.dynamic_rotate %55 by %c241_i32_33 dim 1 : vector<8x256xf32>, i32 -> vector<8x256xf32>
    %75 = vector.broadcast %13 : vector<1x256xf32> to vector<8x256xf32>
    %76 = arith.mulf %74, %75 : vector<8x256xf32>
    %c240_i32_34 = arith.constant 240 : i32
    %77 = tpu.dynamic_rotate %55 by %c240_i32_34 dim 1 : vector<8x256xf32>, i32 -> vector<8x256xf32>
    %78 = vector.broadcast %15 : vector<1x256xf32> to vector<8x256xf32>
    %79 = arith.mulf %77, %78 : vector<8x256xf32>
    %c239_i32_35 = arith.constant 239 : i32
    %80 = tpu.dynamic_rotate %55 by %c239_i32_35 dim 1 : vector<8x256xf32>, i32 -> vector<8x256xf32>
    %81 = vector.broadcast %17 : vector<1x256xf32> to vector<8x256xf32>
    %82 = arith.mulf %80, %81 : vector<8x256xf32>
    %83 = tpu.concatenate %59, %62, %65, %68, %70, %73, %76, %79, %82 in 0 : vector<8x256xf32>, vector<8x256xf32>, vector<8x256xf32>, vector<8x256xf32>, vector<8x256xf32>, vector<8x256xf32>, vector<8x256xf32>, vector<8x256xf32>, vector<8x256xf32> -> vector<72x256xf32>
    %84 = arith.truncf %83 : vector<72x256xf32> to vector<72x256xbf16>
    %cst_36 = arith.constant dense<0.000000e+00> : vector<8x256xf32>
    %85 = tpu.matmul %56, %84, %cst_36 {dimension_numbers = #tpu.dot_dimension_numbers<[1], [0], [0], [1], [0, 0, 1, 1], [], []>} : vector<8x72xbf16>, vector<72x256xbf16>, vector<8x256xf32> -> vector<8x256xf32>
    %c0_37 = arith.constant 0 : index
    %c0_38 = arith.constant 0 : index
    %86 = vector.load %arg6[%c0_37, %c0_38] : memref<8x1xf32, #tpu.memory_space<vmem>>, vector<8x1xf32>
    %87 = vector.broadcast %86 : vector<8x1xf32> to vector<8x256xf32>
    %88 = arith.addf %85, %87 : vector<8x256xf32>
    %89 = arith.addf %88, %20 : vector<8x256xf32>
    %cst_39 = arith.constant 0.000000e+00 : f32
    %90 = vector.broadcast %cst_39 : f32 to vector<8x256xf32>
    %91 = arith.maximumf %89, %90 : vector<8x256xf32>
    %c0_40 = arith.constant 0 : index
    %c0_41 = arith.constant 0 : index
    %c0_42 = arith.constant 0 : index
    %92 = vector.load %arg7[%c0_40, %c0_41, %c0_42] : memref<1x8x256xf32, #tpu.memory_space<vmem>>, vector<1x8x256xf32>
    %93 = vector.shape_cast %92 : vector<1x8x256xf32> to vector<8x256xf32>
    %94 = vector.shape_cast %91 : vector<8x256xf32> to vector<1x8x256xf32>
    tpu.vector_store %arg7[%c0_40, %c0_41, %c0_42], %94 {strides = array<i32>} : memref<1x8x256xf32, #tpu.memory_space<vmem>>, vector<1x8x256xf32>,
    return
  }
  func.func @transform_0(%arg0: i32) -> (i32, i32, i32) {
    %c0_i32 = arith.constant 0 : i32
    %c0_i32_0 = arith.constant 0 : i32
    %c0_i32_1 = arith.constant 0 : i32
    return %arg0, %c0_i32, %c0_i32_0 : i32, i32, i32
  }
  func.func @transform_1(%arg0: i32) -> (i32, i32, i32) {
    %c0_i32 = arith.constant 0 : i32
    %c0_i32_0 = arith.constant 0 : i32
    %c0_i32_1 = arith.constant 0 : i32
    %c0_i32_2 = arith.constant 0 : i32
    return %c0_i32, %c0_i32_0, %c0_i32_1 : i32, i32, i32
  }
  func.func @transform_2(%arg0: i32) -> (i32, i32) {
    %c0_i32 = arith.constant 0 : i32
    %c0_i32_0 = arith.constant 0 : i32
    %c0_i32_1 = arith.constant 0 : i32
    return %c0_i32, %c0_i32_0 : i32, i32
  }
  func.func @transform_3(%arg0: i32) -> (i32, i32) {
    %c0_i32 = arith.constant 0 : i32
    %c0_i32_0 = arith.constant 0 : i32
    %c0_i32_1 = arith.constant 0 : i32
    return %c0_i32, %c0_i32_0 : i32, i32
  }
  func.func @transform_4(%arg0: i32) -> (i32, i32) {
    %c0_i32 = arith.constant 0 : i32
    %c0_i32_0 = arith.constant 0 : i32
    %c0_i32_1 = arith.constant 0 : i32
    return %c0_i32, %c0_i32_0 : i32, i32
  }
  func.func @transform_5(%arg0: i32) -> (i32, i32) {
    %c0_i32 = arith.constant 0 : i32
    %c0_i32_0 = arith.constant 0 : i32
    %c0_i32_1 = arith.constant 0 : i32
    return %c0_i32, %c0_i32_0 : i32, i32
  }
  func.func @transform_6(%arg0: i32) -> (i32, i32, i32) {
    %c0_i32 = arith.constant 0 : i32
    %c0_i32_0 = arith.constant 0 : i32
    %c0_i32_1 = arith.constant 0 : i32
    return %arg0, %c0_i32, %c0_i32_0 : i32, i32, i32
  }
}

</mosaic_0001>

<bundles_post_ra>
// kernel: tpu_custom_call.1
= control target key start
LH: loop header
LB: loop body
LE: loop exit
PB: predicated region body
PF: predicated region fallthrough
CT: control target
= control target key end

     0   :  { %11 = vsyncpa [#allocation3], 0  ;;  %s1441_s0 = inlined_call_operand.vmem [shape: bf16[2,8,256], index: 0, kind: input, shape index: {}]   ;;  %s1442_s1 = inlined_call_operand.hbm [shape: f32[9,1,256], index: 1, kind: input, shape index: {}]   ;;  %s1443_s2 = inlined_call_operand.hbm [shape: bf16[8,72], index: 2, kind: input, shape index: {}]   ;;  %s1444_s3 = inlined_call_operand.vmem [shape: f32[8,1], index: 3, kind: input, shape index: {}]   ;;  %s1445_s4 = inlined_call_operand.hbm [shape: bf16[8,72], index: 4, kind: input, shape index: {}]   ;;  %s1446_s5 = inlined_call_operand.vmem [shape: f32[8,1], index: 5, kind: input, shape index: {}]   ;;  %s1447_s6 = inlined_call_operand.hbm [shape: f32[2,8,256], index: 6, kind: output, shape index: {}]  }
   0x1   :  { %12 = vsyncpa [#allocation6], 0 }
   0x2   :  { %13 = vsyncpa [#allocation4], 0 }
   0x3   :  { %15 = vsyncpa [#allocation4 + $0x1], 0  ;;  %s1084_s21 = smov 0   ;;  %s1086_s22 = smov 0  }
   0x4   :  { %s1088_s23 = smov 0   ;;  %s1090_s24 = smov 0  }
   0x5 LB: > { %s1105_s25 = sadd.s32 4294967295, %s1033_s24   ;;  %s725_s26 = sadd.s32 4294967294, %s1033_s24   ;;  %s1033_s24 = sphi %s1090_s24, %s1455_s24   ;;  %s1029_s23 = sphi %s1088_s23, %s1454_s23   ;;  %s1025_s22 = sphi %s1086_s22, %s1453_s22   ;;  %s1021_s21 = sphi %s1084_s21, %s1452_s21  }
   0x6   : > { %s1109_s27 = sadd.s32 1, %s1033_s24   ;;  %s159_s28 = sadd.s32 1, %s1029_s23 }
   0x7   : > { %s156_s29 = ssub.s32 %s1033_s24, %s1109_s27  ;;  %p169_p0 = scmp.ne.s32.totalorder %s1029_s23, %s1025_s22 }
   0x8   : > { %p157_p1 = scmp.eq.s32.totalorder %s156_s29, 0  ;;  %p170_p2 = scmp.eq.s32.totalorder %s1105_s25, 1 }
   0x9   : > { %p175_p3 = scmp.ne.s32.totalorder %s1025_s22, %s1021_s21  ;;  %p176_p4 = scmp.eq.s32.totalorder %s725_s26, 1 }
   0xa   : > { %s1120_s30 = scalar_select %p157_p1, %s1029_s23, %s159_s28  }
   0xb   : > { %p1122_p5 = por %p170_p2, %p169_p0  ;;  %p1126_p6 = por %p176_p4, %p175_p3 }
   0xc   : > { %p726_p7 = scmp.ge.s32.totalorder %s1033_s24, 1  ;;  %p183_p8 = scmp.lt.s32.totalorder %s1033_s24, 3 }
   0xd   : > { %p777_p9 = scmp.eq.s32.totalorder %s1105_s25, 0  ;;  %s209_s12 = sshll.u32 %s1443_s2, 4  ;;  %s210_s12 = int_to_ptr.hbm [resolvable:$true] %s209_s12 }
   0xe   : > { %p1133_p10 = pnand %p726_p7, %p183_p8  ;;  %s1035_s13 = smov [#allocation5]  }
   0xf   : > { %s211_s14 = sshll.u32 %s1035_s13, 4  ;;  %s194_s17 = sshll.u32 %s1442_s1, 4  ;;  %s212_s14 = int_to_ptr.vmem [resolvable:$true] %s211_s14  ;;  %s195_s17 = int_to_ptr.hbm [resolvable:$true] %s194_s17 }
  0x10   : > { %p763_p11 = pneg %p1133_p10  ;;  %s1036_s19 = smov [#allocation2]  }
  0x11   : > { %s196_s20 = sshll.u32 %s1036_s19, 4  ;;  %s1037_s26 = smov 32   ;;  %s197_s20 = int_to_ptr.vmem [resolvable:$true] %s196_s20 }
  0x12   : > { %p1147_p12 = pnand %p777_p9, %p763_p11  ;;  %s1038_s28 = smov 2  }
  0x13   : > { %s224_s11 = sshll.u32 %s1445_s4, 4  ;;  %s1039_s13 = smov [#allocation7]   ;;  %s225_s11 = int_to_ptr.hbm [resolvable:$true] %s224_s11 }
  0x14   : > { %769 = dma.hbm_to_vmem [thread:$0]  (!%p1147_p12), %s210_s12, 64, %s212_s14, [#allocation6]  }
  0x15   : > { %766 = dma.hbm_to_vmem [thread:$0]  (!%p1147_p12), %s195_s17, 288, %s197_s20, [#allocation3], %s1037_s26, %s1037_s26, %s1038_s28  }
  0x16   : > { %s226_s15 = sshll.u32 %s1039_s13, 4  ;;  %250 = sbr.rel (%p1133_p10) target bundleno = 622 (0x26e), region = 44  ;;  %s227_s15 = int_to_ptr.vmem [resolvable:$true] %s226_s15 }
  0x17   : > { %772 = dma.hbm_to_vmem [thread:$0]  (!%p1147_p12), %s225_s11, 64, %s227_s15, [#allocation6]  }
  0x1b   : > { %1008 = dma.done.wait (%p777_p9), [#allocation3], 288  }
  0x1c   : > { %1010 = vsyncadd (%p777_p9), [#allocation3], 4294967008 }
  0x1d   : > { %1012 = dma.done.wait (%p777_p9), [#allocation6], 128  }
  0x1e   : > { %1014 = vsyncadd (%p777_p9), [#allocation6], 4294967168  ;;  %p291_p13 = scmp.lt.s32.totalorder %s1105_s25, 1  ;;  %s1040_s18 = smov 111   ;;  %v322_v4 = vlaneseq  ;;  %v1193_v7 = vld [vmem:[#allocation2 + $0x10] sm:$0x3] }
  0x1f   : > { %s1041_s19 = smov 112   ;;  %s1042_s20 = smov 15   ;;  %v1195_v8 = vld [vmem:[#allocation2 + $0xe] sm:$0x3]  ;;  %v1198_v9 = vld [vmem:[#allocation2 + $0xc] sm:$0x3] }
  0x20   : > { %s292_s12 = scalar_select %p291_p13, %s1105_s25, 1  ;;  %v1189_v5 = vand.u32 127, %v322_v4  ;;  %v449_v10 = vld [vmem:[%s1444_s3] sm:$0xff]  ;;  %v433_v13 = vperm.slane %v1193_v7, 0  ;;  %v434_v14 = vperm.slane %v1193_v7, 1  ;;  %v419_v15 = vperm.slane %v1195_v8, 0 }
  0x21   : > { %s1043_s26 = smov 113   ;;  %s1044_s28 = smov 127   ;;  %v1048_v16 = vmov 0   ;;  %vm459_vm2 = vcmask 1043456   ;;  %v420_v19 = vperm.slane %v1195_v8, 1  ;;  %v405_v23 = vperm.slane %v1198_v9, 0 }
  0x22   : > { %s747_s14 = sshll.u32 %s292_s12, 3  ;;  %s1045_s29 = smov 1   ;;  %vm429_vm0 = vcmp.lt.s32.totalorder %v1189_v5, 111  ;;  %vm415_vm1 = vcmp.lt.s32.totalorder %v1189_v5, 112  ;;  %870 = vset.pattern.permute.xlu2 %v1048_v16  ;;  %871 = vset.pattern.permute.xlu1 %v1048_v16  ;;  %v1208_v20 = vld [vmem:[#allocation2 + $0x8] sm:$0x3] }
  0x23   : > { %s295_s17 = scalar_lea.vmem %s1441_s0, %s747_s14  ;;  %s1046_s10 = smov 16   ;;  %872 = vset.pattern.permute.xlu0 %v1048_v16  ;;  %vm401_vm3 = vcmp.lt.s32.totalorder %v1189_v5, 113  ;;  %v1214_v24 = vld [vmem:[#allocation2 + $0x4] sm:$0x3]  ;;  %v1220_v29 = vld [vmem:[#allocation2 + $0x6] sm:$0x3] }
  0x24   : > { %v314_v0 = vld [vmem:[%s295_s17] sm:$0xff]  ;;  %s1047_s11 = smov 17   ;;  %v1226_v32 = vld [vmem:[#allocation2 + $0xa] sm:$0x3]  ;;  %v377_v33 = vperm.slane %v1208_v20, 0  ;;  %v378_v34 = vperm.slane %v1208_v20, 1 }
  0x25   : > { %v1175_v1 = vunpack.c.l.bf16 %v314_v0  ;;  %v1177_v2 = vunpack.c.h.bf16 %v314_v0  ;;  %v406_v35 = vperm.slane %v1198_v9, 1  ;;  %vm352_vm4 = vcmp.lt.s32.totalorder %v1189_v5, 15  ;;  %s288_s16 = sand.u32 1, %s1025_s22   ;;  %s748_s17 = sshll.u32 %s1105_s25, 4 }
  0x26   : > { %v356_v36 = vperm.slane %v1214_v24, 0  ;;  %vm366_vm5 = vcmp.lt.s32.totalorder %v1189_v5, 1  ;;  %vm387_vm6 = vcmp.lt.s32.totalorder %v1189_v5, 127  ;;  %v370_v39 = vperm.slane %v1220_v29, 0  ;;  %s735_s9 = sshll.u32 %s288_s16, 4  ;;  %s619_s25 = scalar_lea.sflag [#allocation4], %s288_s16 }
  0x27   : > { %v830_v3 = vpack.i.bf16 %v1177_v2, %v1175_v1  ;;  %v391_v43 = vperm.slane %v1226_v32, 0  ;;  %v392_v44 = vperm.slane %v1226_v32, 1  ;;  %v381_v49 = vmul.f32 %v377_v33, %v1175_v1  ;;  %s983_s12 = scalar_lea.hbm %s1447_s6, 32 }
  0x28   : > { %v382_v50 = vmul.f32 %v378_v34, %v1177_v2  ;;  %v357_v16 = vperm.slane %v1214_v24, 1  ;;  %vm324_vm7 = vcmp.lt.s32.totalorder %v1189_v5, 17  ;;  %vm338_vm8 = vcmp.lt.s32.totalorder %v1189_v5, 16 }
  0x29   : > { %831 = vrot.lane.b32.xlu0 %v830_v3, %s1040_s18  ;;  %841 = vrot.lane.b32.xlu1 %v830_v3, %s1041_s19  ;;  %vm455_vm9 = vcmask 588800  }
  0x2a   : > { %851 = vrot.lane.b32.xlu2 %v830_v3, %s1042_s20 }
  0x31   : > { %836 = vrot.lane.b32.xlu0 %v830_v3, %s1043_s26  ;;  %846 = vrot.lane.b32.xlu1 %v830_v3, %s1044_s28 }
  0x32   : > { %856 = vrot.lane.b32.xlu2 %v830_v3, %s1045_s29 }
  0x39   : > { %866 = vrot.lane.b32.xlu1 %v830_v3, %s1046_s10  ;;  %861 = vrot.lane.b32.xlu0 %v830_v3, %s1047_s11 }
  0x3a   : > { %452 = vperm.xlu2 %870, %v449_v10   ;;  %v1272_v10 = vld [vmem:[#allocation2 + $0x2] sm:$0x3] }
  0x84   : > { %v1191_v6 = vpop.permute.xlu2 %851 }
  0x85   : > { %v854_v21 = vunpack.i.h.bf16 %v1191_v6  ;;  %v853_v22 = vunpack.i.l.bf16 %v1191_v6  ;;  %v1270_v6 = vld [vmem:[#allocation2] sm:$0x3] }
  0x8c   : > { %v857_v40 = vpop.permute.xlu2 %856 }
  0x8d   : > { %v859_v55 = vunpack.i.h.bf16 %v857_v40  ;;  %v858_v56 = vunpack.i.l.bf16 %v857_v40  ;;  %v343_v40 = vperm.slane %v1272_v10, 1 }
  0x9b   : > { %v832_v11 = vpop.permute.xlu0 %831  ;;  %v842_v12 = vpop.permute.xlu1 %841 }
  0x9c   : > { %v834_v17 = vunpack.i.h.bf16 %v832_v11  ;;  %v833_v18 = vunpack.i.l.bf16 %v832_v11  ;;  %v844_v25 = vunpack.i.h.bf16 %v842_v12  ;;  %v843_v26 = vunpack.i.l.bf16 %v842_v12 }
  0x9d   : > { %v354_v11 = vsel %vm352_vm4, %v854_v21, %v853_v22  ;;  %v353_v12 = vsel %vm352_vm4, %v853_v22, %v854_v21  ;;  %v342_v21 = vperm.slane %v1272_v10, 0 }
  0x9e   : > { %v430_v27 = vsel %vm429_vm0, %v833_v18, %v834_v17  ;;  %v431_v28 = vsel %vm429_vm0, %v834_v17, %v833_v18  ;;  %v416_v41 = vsel %vm415_vm1, %v843_v26, %v844_v25  ;;  %v417_v42 = vsel %vm415_vm1, %v844_v25, %v843_v26 }
  0x9f   : > { %v437_v30 = vmul.f32 %v433_v13, %v430_v27  ;;  %v438_v31 = vmul.f32 %v434_v14, %v431_v28  ;;  %v423_v57 = vmul.f32 %v419_v15, %v416_v41  ;;  %v424_v58 = vmul.f32 %v420_v19, %v417_v42 }
  0xa0   : > { %v371_v17 = vperm.slane %v1220_v29, 1  ;;  %v368_v26 = vsel %vm366_vm5, %v859_v55, %v858_v56  ;;  %v367_v27 = vsel %vm366_vm5, %v858_v56, %v859_v55  ;;  %v328_v28 = vperm.slane %v1270_v6, 0 }
  0xa1   : > { %v447_v37 = vpack.c.bf16 %v437_v30, %v437_v30  ;;  %v448_v38 = vpack.c.bf16 %v438_v31, %v438_v31 }
  0xa3   : > { %v837_v45 = vpop.permute.xlu0 %836  ;;  %v461_v46 = vsel %vm459_vm2, %v447_v37, 0  ;;  %v464_v47 = vsel %vm459_vm2, %v448_v38, 0  ;;  %v847_v48 = vpop.permute.xlu1 %846  ;;  %v329_v38 = vperm.slane %v1270_v6, 1 }
  0xa4   : > { %v839_v51 = vunpack.i.h.bf16 %v837_v45  ;;  %v838_v52 = vunpack.i.l.bf16 %v837_v45  ;;  %469 = vmatpush.bf16.msra.mxu0 %v461_v46  ;;  %482 = vmatpush.bf16.msra.mxu1 %v464_v47  ;;  %v849_v53 = vunpack.i.h.bf16 %v847_v48  ;;  %v848_v54 = vunpack.i.l.bf16 %v847_v48 }
  0xa5   : > { %v360_v47 = vmul.f32 %v356_v36, %v354_v11  ;;  %v374_v48 = vmul.f32 %v370_v39, %v368_v26 }
  0xa6   : > { %v402_v59 = vsel %vm401_vm3, %v838_v52, %v839_v51  ;;  %v403_v60 = vsel %vm401_vm3, %v839_v51, %v838_v52  ;;  %v388_v61 = vsel %vm387_vm6, %v848_v54, %v849_v53  ;;  %v389_v62 = vsel %vm387_vm6, %v849_v53, %v848_v54 }
  0xa7   : > { %v409_v63 = vmul.f32 %v405_v23, %v402_v59  ;;  %v410_v0 = vmul.f32 %v406_v35, %v403_v60  ;;  %v395_v3 = vmul.f32 %v391_v43, %v388_v61  ;;  %v396_v4 = vmul.f32 %v392_v44, %v389_v62 }
  0xa8   : > { %v361_v51 = vmul.f32 %v357_v16, %v353_v12  ;;  %v441_v59 = vpack.c.bf16 %v374_v48, %v360_v47 }
  0xa9   : > { %v445_v18 = vpack.c.bf16 %v423_v57, %v409_v63  ;;  %v446_v25 = vpack.c.bf16 %v424_v58, %v410_v0  ;;  %v443_v31 = vpack.c.bf16 %v395_v3, %v381_v49  ;;  %v444_v37 = vpack.c.bf16 %v396_v4, %v382_v50  ;;  %v317_v63 = vld [vmem:[#allocation5] sm:$0xf]  ;;  %v453_v0 = vpop.permute.xlu2 %452 }
  0xaa   : > { %v375_v49 = vmul.f32 %v371_v17, %v367_v27 }
  0xab   : > { %470 = vmatpush.bf16.msra.mxu0 %v445_v18  ;;  %483 = vmatpush.bf16.msra.mxu1 %v446_v25  ;;  %v867_v22 = vpop.permute.xlu1 %866  ;;  %v862_v30 = vpop.permute.xlu0 %861 }
  0xac   : > { %v869_v41 = vunpack.i.h.bf16 %v867_v22  ;;  %v868_v42 = vunpack.i.l.bf16 %v867_v22  ;;  %v864_v45 = vunpack.i.h.bf16 %v862_v30  ;;  %v863_v46 = vunpack.i.l.bf16 %v862_v30 }
  0xad   : > { %v442_v60 = vpack.c.bf16 %v375_v49, %v361_v51 }
  0xae   : > { %v326_v50 = vsel %vm324_vm7, %v864_v45, %v863_v46  ;;  %v340_v52 = vsel %vm338_vm8, %v869_v41, %v868_v42  ;;  %v325_v53 = vsel %vm324_vm7, %v863_v46, %v864_v45  ;;  %v339_v54 = vsel %vm338_vm8, %v868_v42, %v869_v41 }
  0xaf   : > { %471 = vmatpush.bf16.msra.mxu0 %v443_v31  ;;  %484 = vmatpush.bf16.msra.mxu1 %v444_v37  ;;  %v332_v55 = vmul.f32 %v328_v28, %v326_v50  ;;  %v346_v56 = vmul.f32 %v342_v21, %v340_v52  ;;  %v333_v57 = vmul.f32 %v329_v38, %v325_v53 }
  0xb0   : > { %v347_v58 = vmul.f32 %v343_v40, %v339_v54 }
  0xb1   : > { %v439_v61 = vpack.c.bf16 %v346_v56, %v332_v55 }
  0xb2   : > { %v440_v62 = vpack.c.bf16 %v347_v58, %v333_v57 }
  0xb3   : > { %472 = vmatpush.bf16.msra.mxu0 %v441_v59  ;;  %485 = vmatpush.bf16.msra.mxu1 %v442_v60 }
  0xb7   : > { %473 = vmatpush.bf16.msra.mxu0 %v439_v61  ;;  %486 = vmatpush.bf16.msra.mxu1 %v440_v62 }
  0xba   : > { %738 = vmatmul.msk.bf16.vlgmr.msra.gmra.mxu0 %vm455_vm9, %v317_v63  ;;  %739 = vmatmul.msk.bf16.vlgmr.msra.gmra.mxu1 %vm455_vm9, %v317_v63 }
 0x137   : > { %v475_v3 = vpop.f32.mrf.mxu0  ;;  %v488_v4 = vpop.f32.mrf.mxu1 }
 0x138   : > { %v476_v11 = vadd.f32 %v475_v3, %v453_v0  ;;  %v489_v12 = vadd.f32 %v488_v4, %v453_v0 }
 0x13a   : > { %v492_v18 = vmax.f32 %v476_v11, 0.0  ;;  %v493_v25 = vmax.f32 %v489_v12, 0.0 }
 0x13c   : > { %555 = vrot.lane.b32.xlu1 %v493_v25, %s1040_s18  ;;  %537 = vrot.lane.b32.xlu2 %v492_v18, %s1043_s26  ;;  %v527_v62 = vmul.f32 %v492_v18, %v377_v33  ;;  %v528_v63 = vmul.f32 %v493_v25, %v378_v34 }
 0x13d   : > { %553 = vrot.lane.b32.xlu0 %v492_v18, %s1040_s18 }
 0x13f   : > { %v477_v26 = vpop.f32.mrf.mxu0  ;;  %v490_v27 = vpop.f32.mrf.mxu1 }
 0x144   : > { %545 = vrot.lane.b32.xlu1 %v492_v18, %s1041_s19  ;;  %547 = vrot.lane.b32.xlu2 %v493_v25, %s1041_s19 }
 0x145   : > { %539 = vrot.lane.b32.xlu0 %v493_v25, %s1043_s26  ;;  %s290_s26 = scalar_lea.vmem [#allocation8], %s735_s9 }
 0x14c   : > { %531 = vrot.lane.b32.xlu1 %v493_v25, %s1044_s28  ;;  %511 = vrot.lane.b32.xlu2 %v492_v18, %s1042_s20 }
 0x14d   : > { %529 = vrot.lane.b32.xlu0 %v492_v18, %s1044_s28  ;;  %s632_s28 = sshll.u32 %s290_s26, 4  ;;  %s633_s28 = int_to_ptr.vmem [resolvable:$true] %s632_s28 }
 0x154   : > { %519 = vrot.lane.b32.xlu1 %v492_v18, %s1045_s29  ;;  %521 = vrot.lane.b32.xlu2 %v493_v25, %s1045_s29 }
 0x155   : > { %513 = vrot.lane.b32.xlu0 %v493_v25, %s1042_s20  ;;  %s630_s20 = scalar_lea.hbm %s1447_s6, %s748_s17 }
 0x156   : > { %s634_s29 = sshll.u32 %s630_s20, 4  ;;  %s635_s29 = int_to_ptr.hbm [resolvable:$true] %s634_s29 }
 0x15c   : > { %497 = vrot.lane.b32.xlu1 %v493_v25, %s1047_s11  ;;  %503 = vrot.lane.b32.xlu2 %v492_v18, %s1046_s10 }
 0x15d   : > { %495 = vrot.lane.b32.xlu0 %v492_v18, %s1047_s11 }
 0x165   : > { %505 = vrot.lane.b32.xlu0 %v493_v25, %s1046_s10  ;;  %s977_s10 = sshra.s32 %s635_s29, 4  ;;  %s978_s10 = int_to_ptr.hbm [resolvable:$true] %s977_s10 }
 0x166   : > { %s979_s11 = scalar_lea.hbm %s978_s10, 16  ;;  %p984_p3 = scmp.lt.s32.totalorder %s978_s10, %s1447_s6 }
 0x167   : > { %p980_p0 = scmp.ne.s32.totalorder %s978_s10, %s979_s11  ;;  %p985_p4 = scmp.lt.s32.totalorder %s983_s12, %s979_s11 }
 0x169   : > { %p981_p1 = pnand %p980_p0, %p1122_p5  ;;  %p986_p7 = por %p985_p4, %p984_p3 }
 0x16b   : > { %p982_p2 = pneg %p981_p1 }
 0x16d   : > { %p987_p8 = pnand %p986_p7, %p982_p2 }
 0x196   : > { %v538_v22 = vpop.permute.xlu2 %537 }
 0x19e   : > { %v548_v46 = vpop.permute.xlu2 %547 }
 0x1a6   : > { %v512_v60 = vpop.permute.xlu2 %511 }
 0x1ae   : > { %v556_v30 = vpop.permute.xlu1 %555  ;;  %v522_v4 = vpop.permute.xlu2 %521 }
 0x1af   : > { %v554_v31 = vpop.permute.xlu0 %553 }
 0x1b0   : > { %v557_v37 = vsel %vm429_vm0, %v554_v31, %v556_v30  ;;  %v558_v41 = vsel %vm429_vm0, %v556_v30, %v554_v31 }
 0x1b1   : > { %v559_v42 = vmul.f32 %v557_v37, %v433_v13  ;;  %v560_v45 = vmul.f32 %v558_v41, %v434_v14 }
 0x1b3   : > { %v569_v47 = vpack.c.bf16 %v559_v42, %v559_v42  ;;  %v570_v48 = vpack.c.bf16 %v560_v45, %v560_v45 }
 0x1b5   : > { %v581_v51 = vsel %vm459_vm2, %v569_v47, 0  ;;  %v584_v49 = vsel %vm459_vm2, %v570_v48, 0  ;;  %v494_v47 = vld [vmem:[#allocation7] sm:$0xf] }
 0x1b6   : > { %589 = vmatpush.bf16.msra.mxu2 %v581_v51  ;;  %602 = vmatpush.bf16.msra.mxu3 %v584_v49  ;;  %v546_v50 = vpop.permute.xlu1 %545  ;;  %v504_v30 = vpop.permute.xlu2 %503 }
 0x1b7   : > { %v549_v52 = vsel %vm415_vm1, %v546_v50, %v548_v46  ;;  %v550_v53 = vsel %vm415_vm1, %v548_v46, %v546_v50  ;;  %v540_v13 = vpop.permute.xlu0 %539 }
 0x1b8   : > { %v551_v7 = vmul.f32 %v549_v52, %v419_v15  ;;  %v552_v14 = vmul.f32 %v550_v53, %v420_v19  ;;  %v541_v54 = vsel %vm401_vm3, %v538_v22, %v540_v13  ;;  %v542_v55 = vsel %vm401_vm3, %v540_v13, %v538_v22 }
 0x1b9   : > { %v543_v56 = vmul.f32 %v541_v54, %v405_v23  ;;  %v544_v57 = vmul.f32 %v542_v55, %v406_v35  ;;  %v571_v23 = vld [vmem:[%s1446_s5] sm:$0xff] }
 0x1ba   : > { %574 = vperm.xlu1 %871, %v571_v23  }
 0x1bb   : > { %v567_v58 = vpack.c.bf16 %v551_v7, %v543_v56  ;;  %v568_v59 = vpack.c.bf16 %v552_v14, %v544_v57 }
 0x1bd   : > { %590 = vmatpush.bf16.msra.mxu2 %v567_v58  ;;  %603 = vmatpush.bf16.msra.mxu3 %v568_v59 }
 0x1be   : > { %v532_v15 = vpop.permute.xlu1 %531 }
 0x1bf   : > { %v530_v8 = vpop.permute.xlu0 %529 }
 0x1c0   : > { %v533_v19 = vsel %vm387_vm6, %v530_v8, %v532_v15  ;;  %v534_v61 = vsel %vm387_vm6, %v532_v15, %v530_v8 }
 0x1c1   : > { %v535_v9 = vmul.f32 %v533_v19, %v391_v43  ;;  %v536_v35 = vmul.f32 %v534_v61, %v392_v44 }
 0x1c3   : > { %v565_v0 = vpack.c.bf16 %v535_v9, %v527_v62  ;;  %v566_v3 = vpack.c.bf16 %v536_v35, %v528_v63 }
 0x1c5   : > { %591 = vmatpush.bf16.msra.mxu2 %v565_v0  ;;  %604 = vmatpush.bf16.msra.mxu3 %v566_v3 }
 0x1c6   : > { %v520_v11 = vpop.permute.xlu1 %519 }
 0x1c7   : > { %v523_v12 = vsel %vm366_vm5, %v520_v11, %v522_v4  ;;  %v524_v32 = vsel %vm366_vm5, %v522_v4, %v520_v11  ;;  %v514_v43 = vpop.permute.xlu0 %513 }
 0x1c8   : > { %v525_v33 = vmul.f32 %v524_v32, %v370_v39  ;;  %v526_v20 = vmul.f32 %v523_v12, %v371_v17  ;;  %v515_v34 = vsel %vm352_vm4, %v512_v60, %v514_v43  ;;  %v516_v44 = vsel %vm352_vm4, %v514_v43, %v512_v60 }
 0x1c9   : > { %v517_v18 = vmul.f32 %v516_v44, %v356_v36  ;;  %v518_v25 = vmul.f32 %v515_v34, %v357_v16 }
 0x1cb   : > { %v563_v26 = vpack.c.bf16 %v525_v33, %v517_v18  ;;  %v564_v27 = vpack.c.bf16 %v526_v20, %v518_v25 }
 0x1cd   : > { %592 = vmatpush.bf16.msra.mxu2 %v563_v26  ;;  %605 = vmatpush.bf16.msra.mxu3 %v564_v27 }
 0x1ce   : > { %v498_v22 = vpop.permute.xlu1 %497 }
 0x1cf   : > { %v496_v39 = vpop.permute.xlu0 %495 }
 0x1d0   : > { %v499_v29 = vsel %vm324_vm7, %v496_v39, %v498_v22  ;;  %v500_v17 = vsel %vm324_vm7, %v498_v22, %v496_v39 }
 0x1d1   : > { %v501_v16 = vmul.f32 %v500_v17, %v328_v28  ;;  %v502_v37 = vmul.f32 %v499_v29, %v329_v38 }
 0x1d7   : > { %v506_v31 = vpop.permute.xlu0 %505 }
 0x1d8   : > { %v507_v24 = vsel %vm338_vm8, %v504_v30, %v506_v31  ;;  %v508_v36 = vsel %vm338_vm8, %v506_v31, %v504_v30 }
 0x1d9   : > { %v509_v41 = vmul.f32 %v508_v36, %v342_v21  ;;  %v510_v42 = vmul.f32 %v507_v24, %v343_v40 }
 0x1db   : > { %v561_v45 = vpack.c.bf16 %v509_v41, %v501_v16  ;;  %v562_v46 = vpack.c.bf16 %v510_v42, %v502_v37 }
 0x1dd   : > { %593 = vmatpush.bf16.msra.mxu2 %v561_v45  ;;  %606 = vmatpush.bf16.msra.mxu3 %v562_v46 }
 0x1e0   : > { %740 = vmatmul.msk.bf16.vlgmr.msra.gmra.mxu2 %vm455_vm9, %v494_v47  ;;  %741 = vmatmul.msk.bf16.vlgmr.msra.gmra.mxu3 %vm455_vm9, %v494_v47 }
 0x22c   : > { %v575_v5 = vpop.permute.xlu1 %574 }
 0x263   : > { %v595_v6 = vpop.f32.mrf.mxu2  ;;  %v608_v28 = vpop.f32.mrf.mxu3 }
 0x264   : > { %v596_v10 = vadd.f32 %v595_v6, %v575_v5  ;;  %v609_v21 = vadd.f32 %v608_v28, %v575_v5 }
 0x266   : > { %v612_v38 = vadd.f32 %v596_v10, %v1175_v1  ;;  %v613_v40 = vadd.f32 %v609_v21, %v1177_v2 }
 0x268   : > { %v614_v48 = vmax.f32 %v612_v38, 0.0  ;;  %v615_v51 = vmax.f32 %v613_v40, 0.0 }
 0x26a   : > { %616 = vst [vmem:[%s290_s26] sm:$0xff] %v614_v48 }
 0x26b   : > { %617 = vst [vmem:[%s290_s26 + $0x8] sm:$0xff] %v615_v51  ;;  %v597_v49 = vpop.f32.mrf.mxu2  ;;  %v610_v50 = vpop.f32.mrf.mxu3 }
 0x26c   : > { %990 = shalt.err (!%p987_p8)
}
 0x26d   : > { %761 = dma.vmem_to_hbm [thread:$0]  (%p1122_p5), %s633_s28, 256, %s635_s29, %s619_s25  }
 0x26e PF: > { %p783_p9 = scmp.ge.s32.totalorder %s1033_s24, 2  ;;  %s646_s16 = sand.u32 1, %s1021_s21  }
 0x26f   : > { %s647_s17 = scalar_lea.sflag [#allocation4], %s646_s16 }
 0x270   : > { %p774_p10 = pnand %p783_p9, %p1126_p6 }
 0x272   : > { %p775_p11 = pneg %p774_p10 }
 0x274   : > { %1016 = dma.done.wait (%p775_p11), %s647_s17, 256  }
 0x275   : > { %1018 = vsyncadd (%p775_p11), %s647_s17, 4294967040  ;;  %p18_p12 = scmp.ge.s32.totalorder %s1109_s27, 4   ;;  %s1452_s21 = smov %s1025_s22 }
 0x276   : > { %s1453_s22 = smov %s1029_s23  ;;  %s1454_s23 = smov %s1120_s30 }
 0x277   : > { %s1455_s24 = smov %s1109_s27  ;;  %20 = sbr.rel (!%p18_p12) target bundleno = 5 (0x5), region = 100 }
 0x27c   :  { %653 = vsyncpa [#allocation3], 1 }
 0x27d   :  { %655 = vsyncpa [#allocation3 + $0x1], 1 }
 0x27e   :  { %656 = vsyncpa [#allocation6], 1 }
 0x27f   :  { %657 = vsyncpa [#allocation4], 1 }
 0x280   :  { %659 = vsyncpa [#allocation4 + $0x1], 1 }

</bundles_post_ra>
